<compile_context>
chip_gen: v7x
topology: tpu7x:2x2x1
jax: 0.10.0
libtpu: 0.0.40
codegen_flags: <defaults>
</compile_context>

<pallas_src>
import functools

import jax
import jax.numpy as jnp
from jax import lax
from jax.experimental import pallas as pl
from jax.experimental.pallas import tpu as pltpu


def _sigmoid(x):
    # sigmoid(x) = 0.5 * (tanh(x/2) + 1): a single EUP op + cheap VPU ops.
    return 0.5 * jnp.tanh(0.5 * x) + 0.5


def _mlp_kernel(x_ref, w1_ref, b1_ref, w2_ref, b2_ref, o_ref):
    # x_ref : (TILE_B, 8)  batch-major block straight from HBM
    # w1_ref: (8, 8)       PyTorch layout (out_features, in_features)
    # b1_ref: (8, 1)
    # w2_ref: (8, 1)       fc2 weight as a column (in_features, out=1)
    # b2_ref: (1, 1)       SMEM scalar
    # o_ref : (1, TILE_B)  lane-dense output (batch on the 128-lane axis)
    x = x_ref[...]

    # fc1:  h[o, b] = sum_i W1[o, i] * x[b, i]   -> (8, TILE_B)
    # Contract the feature axis of both operands; the (tile,8)->(8,tile)
    # relayout happens in-kernel (XLU/MXU), hidden under DMA slack.
    h = lax.dot_general(
        w1_ref[...], x,
        dimension_numbers=(((1,), (1,)), ((), ())),
        preferred_element_type=jnp.float32,
    )
    h = _sigmoid(h + b1_ref[...])               # b1 broadcasts over lanes

    # fc2 (K=8, N=1): VPU multiply + 8-sublane reduce; MXU not worth it here.
    y = jnp.sum(h * w2_ref[...], axis=0, keepdims=True)     # (1, TILE_B)
    y = _sigmoid(y + b2_ref[0, 0])

    o_ref[...] = y.astype(o_ref.dtype)


def _round_up(n, m):
    return ((n + m - 1) // m) * m


def net_forward(x, w1, b1, w2, b2, *, tile_b=64 * 1024):
    """Forward pass of Net.

    x : (B, 8) float32
    w1: (8, 8), b1: (8,)    -- PyTorch nn.Linear(8, 8) layout
    w2: (1, 8), b2: (1,)    -- PyTorch nn.Linear(8, 1) layout
    returns (B, 1) float32
    """
    B, F = x.shape
    assert F == 8, "Net expects 8 input features"

    # Cap tile so the double-buffered working set (~72 B * tile) fits the
    # default scoped-VMEM limit on every chip generation (v5e: 16 MiB).
    tile_b = min(tile_b, 128 * 1024)

    # Keep roughly 8 grid steps so the "parallel" batch axis can shard across
    # both TensorCores on v7x and the DMA double-buffer has work to overlap,
    # while still using large tiles to amortize the ~0.35 us per-step cost.
    tile = min(tile_b, _round_up(pl.cdiv(B, 8), 128))
    if tile >= B:
        tile = B          # single full-array block (always layout-legal)
    grid = (pl.cdiv(B, tile),)

    b1_col = b1.reshape(8, 1)
    w2_col = w2.reshape(8, 1)        # (1, 8) row -> (8, 1) column (same data)
    b2_sc = b2.reshape(1, 1)

    out_row = pl.pallas_call(
        _mlp_kernel,
        out_shape=jax.ShapeDtypeStruct((1, B), jnp.float32),
        grid=grid,
        in_specs=[
            pl.BlockSpec((tile, 8), lambda i: (i, 0)),        # x block (no relayout)
            pl.BlockSpec((8, 8), lambda i: (0, 0)),           # w1 (resident)
            pl.BlockSpec((8, 1), lambda i: (0, 0)),           # b1 (resident)
            pl.BlockSpec((8, 1), lambda i: (0, 0)),           # w2 (resident)
            pl.BlockSpec(memory_space=pltpu.MemorySpace.SMEM),  # b2 scalar
        ],
        out_specs=pl.BlockSpec((1, tile), lambda i: (0, i)),
        compiler_params=pltpu.CompilerParams(
            dimension_semantics=("parallel",),   # megacore split on v7x
        ),
    )(x, w1, b1_col, w2_col, b2_sc)

    # (1, B) -> (B, 1) is a free reshape (same element order).
    return out_row.reshape(B, 1)


def init_params(key):
    """Deterministic init mimicking nn.Linear's uniform(-1/sqrt(in), 1/sqrt(in)).

    Parameters are kept in the PyTorch layout: W is (out_features, in_features).
    """
    k1, k2, k3, k4 = jax.random.split(key, 4)
    bound1 = 1.0 / jnp.sqrt(8.0)
    w1 = jax.random.uniform(k1, (8, 8), jnp.float32, -bound1, bound1)
    b1 = jax.random.uniform(k2, (8,), jnp.float32, -bound1, bound1)
    bound2 = 1.0 / jnp.sqrt(8.0)
    w2 = jax.random.uniform(k3, (1, 8), jnp.float32, -bound2, bound2)
    b2 = jax.random.uniform(k4, (1,), jnp.float32, -bound2, bound2)
    return w1, b1, w2, b2


def _reference(x, w1, b1, w2, b2):
    h = jax.nn.sigmoid(x @ w1.T + b1)
    return jax.nn.sigmoid(h @ w2.T + b2)


if __name__ == "__main__":
    key = jax.random.PRNGKey(0)
    kx, kp = jax.random.split(key)
    w1, b1, w2, b2 = init_params(kp)

    fwd = jax.jit(functools.partial(net_forward))

    # B=8   : single full-array block (tiny-batch path)
    # B=200 : multi-step grid with a partial final block (implicit masking)
    # B=1024: multi-step pipelined grid
    for B in (8, 200, 1024):
        x = jax.random.normal(jax.random.fold_in(kx, B), (B, 8), jnp.float32)
        out = jax.block_until_ready(fwd(x, w1, b1, w2, b2))
        ref = _reference(x, w1, b1, w2, b2)
        assert out.shape == (B, 1), out.shape
        assert jnp.allclose(out, ref, atol=1e-5), f"mismatch vs reference at B={B}"

    print("KERNEL_OK")
</pallas_src>

<mosaic_0001>
module attributes {stable_mosaic.version = 11 : i64} {
  func.func @_mlp_kernel(%arg0: i32, %arg1: memref<8x8xf32, #tpu.memory_space<vmem>>, %arg2: memref<8x8xf32, #tpu.memory_space<vmem>>, %arg3: memref<8x1xf32, #tpu.memory_space<vmem>>, %arg4: memref<8x1xf32, #tpu.memory_space<vmem>>, %arg5: memref<1x1xf32, #tpu.memory_space<smem>>, %arg6: memref<1x8xf32, #tpu.memory_space<vmem>>) attributes {dimension_semantics = [#tpu.dimension_semantics<parallel>], iteration_bounds = array<i64: 1>, scalar_prefetch = 0 : i64, scratch_operands = 0 : i64, tpu.core_type = #tpu.core_type<tc>, window_params = [{transform_indices = @transform_0, window_bounds = array<i64: 8, 8>}, {pipeline_mode = #tpu.pipeline_mode<synchronous>, transform_indices = @transform_1, window_bounds = array<i64: 8, 8>}, {pipeline_mode = #tpu.pipeline_mode<synchronous>, transform_indices = @transform_2, window_bounds = array<i64: 8, 1>}, {pipeline_mode = #tpu.pipeline_mode<synchronous>, transform_indices = @transform_3, window_bounds = array<i64: 8, 1>}, {transform_indices = @transform_4, window_bounds = array<i64: 1, 1>}, {transform_indices = @transform_5, window_bounds = array<i64: 1, 8>}]} {
    %c0 = arith.constant 0 : index
    %c0_0 = arith.constant 0 : index
    %0 = vector.load %arg1[%c0, %c0_0] : memref<8x8xf32, #tpu.memory_space<vmem>>, vector<8x8xf32>
    %c0_1 = arith.constant 0 : index
    %c0_2 = arith.constant 0 : index
    %1 = vector.load %arg2[%c0_1, %c0_2] : memref<8x8xf32, #tpu.memory_space<vmem>>, vector<8x8xf32>
    %cst = arith.constant dense<0.000000e+00> : vector<8x8xf32>
    %2 = tpu.matmul %1, %0, %cst {dimension_numbers = #tpu.dot_dimension_numbers<[1], [1], [0], [0], [0, 0, 1, 0], [], []>} : vector<8x8xf32>, vector<8x8xf32>, vector<8x8xf32> -> vector<8x8xf32>
    %c0_3 = arith.constant 0 : index
    %c0_4 = arith.constant 0 : index
    %3 = vector.load %arg3[%c0_3, %c0_4] : memref<8x1xf32, #tpu.memory_space<vmem>>, vector<8x1xf32>
    %4 = vector.broadcast %3 : vector<8x1xf32> to vector<8x8xf32>
    %5 = arith.addf %2, %4 : vector<8x8xf32>
    %cst_5 = arith.constant 5.000000e-01 : f32
    %6 = vector.broadcast %cst_5 : f32 to vector<8x8xf32>
    %7 = arith.mulf %6, %5 : vector<8x8xf32>
    %8 = math.tanh %7 : vector<8x8xf32>
    %cst_6 = arith.constant 5.000000e-01 : f32
    %9 = vector.broadcast %cst_6 : f32 to vector<8x8xf32>
    %10 = arith.mulf %9, %8 : vector<8x8xf32>
    %cst_7 = arith.constant 5.000000e-01 : f32
    %11 = vector.broadcast %cst_7 : f32 to vector<8x8xf32>
    %12 = arith.addf %10, %11 : vector<8x8xf32>
    %c0_8 = arith.constant 0 : index
    %c0_9 = arith.constant 0 : index
    %13 = vector.load %arg4[%c0_8, %c0_9] : memref<8x1xf32, #tpu.memory_space<vmem>>, vector<8x1xf32>
    %14 = vector.broadcast %13 : vector<8x1xf32> to vector<8x8xf32>
    %15 = arith.mulf %12, %14 : vector<8x8xf32>
    %cst_10 = arith.constant dense<0.000000e+00> : vector<8xf32>
    %16 = vector.multi_reduction <add>, %15, %cst_10 [0] : vector<8x8xf32> to vector<8xf32>
    %17 = vector.shape_cast %16 : vector<8xf32> to vector<1x8xf32>
    %c0_11 = arith.constant 0 : index
    %c0_12 = arith.constant 0 : index
    %18 = memref.load %arg5[%c0_11, %c0_12] : memref<1x1xf32, #tpu.memory_space<smem>>
    %19 = vector.broadcast %18 : f32 to vector<1x8xf32>
    %20 = arith.addf %17, %19 : vector<1x8xf32>
    %cst_13 = arith.constant 5.000000e-01 : f32
    %21 = vector.broadcast %cst_13 : f32 to vector<1x8xf32>
    %22 = arith.mulf %21, %20 : vector<1x8xf32>
    %23 = math.tanh %22 : vector<1x8xf32>
    %cst_14 = arith.constant 5.000000e-01 : f32
    %24 = vector.broadcast %cst_14 : f32 to vector<1x8xf32>
    %25 = arith.mulf %24, %23 : vector<1x8xf32>
    %cst_15 = arith.constant 5.000000e-01 : f32
    %26 = vector.broadcast %cst_15 : f32 to vector<1x8xf32>
    %27 = arith.addf %25, %26 : vector<1x8xf32>
    %c0_16 = arith.constant 0 : index
    %c0_17 = arith.constant 0 : index
    %28 = vector.load %arg6[%c0_16, %c0_17] : memref<1x8xf32, #tpu.memory_space<vmem>>, vector<1x8xf32>
    tpu.vector_store %arg6[%c0_16, %c0_17], %27 {strides = array<i32>} : memref<1x8xf32, #tpu.memory_space<vmem>>, vector<1x8xf32>,
    return
  }
  func.func @transform_0(%arg0: i32) -> (i32, i32) {
    %c0_i32 = arith.constant 0 : i32
    %c0_i32_0 = arith.constant 0 : i32
    return %arg0, %c0_i32 : i32, i32
  }
  func.func @transform_1(%arg0: i32) -> (i32, i32) {
    %c0_i32 = arith.constant 0 : i32
    %c0_i32_0 = arith.constant 0 : i32
    %c0_i32_1 = arith.constant 0 : i32
    return %c0_i32, %c0_i32_0 : i32, i32
  }
  func.func @transform_2(%arg0: i32) -> (i32, i32) {
    %c0_i32 = arith.constant 0 : i32
    %c0_i32_0 = arith.constant 0 : i32
    %c0_i32_1 = arith.constant 0 : i32
    return %c0_i32, %c0_i32_0 : i32, i32
  }
  func.func @transform_3(%arg0: i32) -> (i32, i32) {
    %c0_i32 = arith.constant 0 : i32
    %c0_i32_0 = arith.constant 0 : i32
    %c0_i32_1 = arith.constant 0 : i32
    return %c0_i32, %c0_i32_0 : i32, i32
  }
  func.func @transform_4(%arg0: i32) -> (i32, i32) {
    %c0_i32 = arith.constant 0 : i32
    %c0_i32_0 = arith.constant 0 : i32
    %c0_i32_1 = arith.constant 0 : i32
    return %c0_i32, %c0_i32_0 : i32, i32
  }
  func.func @transform_5(%arg0: i32) -> (i32, i32) {
    %c0_i32 = arith.constant 0 : i32
    %c0_i32_0 = arith.constant 0 : i32
    return %c0_i32, %arg0 : i32, i32
  }
}

</mosaic_0001>

<bundles_post_ra>
// kernel: net_forward.1
= control target key start
LH: loop header
LB: loop body
LE: loop exit
PB: predicated region body
PF: predicated region fallthrough
CT: control target
= control target key end

     0   :  { %vm30_vm0 = vcmask 64512   ;;  %v190_v1 = vmov 0.0   ;;  %vm191_vm1 = vmmov 0   ;;  %s254_s0 = inlined_call_operand.vmem [shape: f32[8,8], index: 0, kind: input, shape index: {}]   ;;  %s255_s1 = inlined_call_operand.vmem [shape: f32[8,8], index: 1, kind: input, shape index: {}]   ;;  %s256_s2 = inlined_call_operand.vmem [shape: f32[8,1], index: 2, kind: input, shape index: {}]   ;;  %s257_s3 = inlined_call_operand.vmem [shape: f32[8,1], index: 3, kind: input, shape index: {}]   ;;  %s258_s4 = inlined_call_operand.<no memory space> [shape: f32[1,1], index: 4, kind: input, shape index: {}]   ;;  %s259_s5 = inlined_call_operand.hbm [shape: f32[1,8], index: 5, kind: output, shape index: {}]  }
   0x1   :  { %v22_v0 = vld [vmem:[%s254_s0] sm:$0xff]  ;;  %152 = vmatprep.subr.mxu0 %v190_v1  ;;  %154 = vmatprep.mubr.msk.f32.mxu0 %vm191_vm1, %v190_v1 }
   0x2   :  { %v24_v2 = vld [vmem:[%s256_s2] sm:$0xff] }
   0x3   :  { %11 = vsyncpa [#allocation4], 0  ;;  %153 = vmatpush3.xpose.msk.msra.mxu0 %vm30_vm0, %v22_v0  ;;  %v23_v3 = vld [vmem:[%s255_s1] sm:$0xff]  ;;  %v192_v4 = vmov 0   ;;  %v126_v22 = vstv %s258_s4  ;;  %vm132_vm2 = vcmask 57344  }
   0x4   :  { %161 = vset.pattern.permute.xlu0 %v192_v4  ;;  %v111_v5 = vld [vmem:[%s257_s3] sm:$0xff]  ;;  %s193_s3 = smov [#allocation3]  }
   0x5   :  { %27 = vperm.xlu0 %161, %v24_v2   ;;  %s140_s25 = sshll.u32 %s193_s3, 4  ;;  %s141_s25 = int_to_ptr.vmem [resolvable:$true] %s140_s25 }
   0x6   :  { %155 = vmatmul.mubr.msk.f32.vlgmr.msra.gmra.mrb[0].mxu0 %vm30_vm0, %v23_v3  ;;  %s166_s26 = scalar_lea.vmem %s141_s25, 16  ;;  %s170_s27 = scalar_lea.vmem %s141_s25, 32 }
   0x7   :  { %p167_p0 = scmp.ne.s32.totalorder %s141_s25, %s166_s26  ;;  %p171_p1 = scmp.lt.s32.totalorder %s141_s25, %s141_s25 }
   0x8   :  { %p172_p2 = scmp.lt.s32.totalorder %s170_s27, %s166_s26 }
   0x9   :  { %114 = vperm.xlu0 %161, %v111_v5  }
   0xa   :  { %p173_p3 = por %p172_p2, %p171_p1 }
   0xc   :  { %p174_p4 = pnand %p173_p3, %p167_p0 }
  0x84   :  { %v28_v6 = vpop.permute.xlu0 %27 }
  0x88   :  { %v115_v14 = vpop.permute.xlu0 %114 }
  0xd9   :  { %v103_v7 = vpop.f32.mrb[0].mxu0 }
  0xda   :  { %v104_v8 = vadd.f32 %v103_v7, %v28_v6  ;;  %v156_v9 = vpop.f32.mrb[1].mxu0 }
  0xdc   :  { %v107_v10 = vmul.f32 0.5, %v104_v8 }
  0xde   :  { %162 = vtanh.f32 %v107_v10 }
  0xe8   :  { %v163_v11 = vpop.eup %162 }
  0xe9   :  { %v109_v12 = vmul.f32 0.5, %v163_v11 }
  0xeb   :  { %v110_v13 = vadd.f32 0.5, %v109_v12 }
  0xed   :  { %v117_v15 = vmul.f32 %v115_v14, %v110_v13 }
  0xef   :  { %v118_v16 = vsel %vm30_vm0, %v117_v15, 0.0 }
  0xf0   :  { %v119_v17 = vrot.slane %v118_v16, 4 }
  0xf2   :  { %v120_v18 = vadd.f32 %v119_v17, %v118_v16 }
  0xf4   :  { %v121_v19 = vrot.slane %v120_v18, 2 }
  0xf6   :  { %v122_v20 = vadd.f32 %v121_v19, %v120_v18 }
  0xf8   :  { %v123_v21 = vrot.slane %v122_v20, 1 }
  0xfa   :  { %v124_v23 = vadd.f32 %v123_v21, %v122_v20 }
  0xfc   :  { %v127_v24 = vadd.f32 %v126_v22, %v124_v23 }
  0xfe   :  { %v128_v25 = vmul.f32 0.5, %v127_v24 }
 0x100   :  { %164 = vtanh.f32 %v128_v25 }
 0x10a   :  { %v165_v26 = vpop.eup %164 }
 0x10b   :  { %v130_v27 = vmul.f32 0.5, %v165_v26 }
 0x10d   :  { %v131_v28 = vadd.f32 0.5, %v130_v27 }
 0x10f   :  { %133 = vst.msk [vmem:[#allocation3] sm:$0x1] %vm132_vm2, %v131_v28 }
 0x110   :  { %177 = shalt.err (!%p174_p4)
}
 0x111   :  { %s178_s29 = scalar_lea.hbm %s259_s5, 16 }
 0x112   :  { %p179_p5 = scmp.ne.s32.totalorder %s259_s5, %s178_s29  ;;  %p182_p6 = scmp.lt.u32.totalorder %s178_s29, %s259_s5 }
 0x114   :  { %p184_p7 = pnand %p182_p6, %p179_p5 }
 0x116   :  { %187 = shalt.err (!%p184_p7)
}
 0x117   :  { %143 = dma.vmem_to_hbm [thread:$0]  %s141_s25, 16, %s259_s5, [#allocation4]  }
 0x118   :  { %188 = dma.done.wait [#allocation4], 16  }
 0x119   :  { %189 = vsyncadd [#allocation4], 4294967280 }
 0x11a   :  { %147 = vsyncpa [#allocation4], 1 }

</bundles_post_ra>
